<compile_context>
chip_gen: v7x
topology: tpu7x:2x2x1
jax: 0.10.0
libtpu: 0.0.40
codegen_flags: <defaults>
</compile_context>

<pallas_src>
import functools
import math

import jax
import jax.numpy as jnp
from jax.experimental import pallas as pl
from jax.experimental.pallas import tpu as pltpu


def _round_up(x, m):
    return ((x + m - 1) // m) * m


def _choose_tile(dim, tile_max, align):
    """Pick (tile, padded_dim). Prefer an aligned tile that divides `dim`
    exactly (no wrapper-side padding copy); otherwise pad to a tile multiple."""
    dim_r = _round_up(dim, align)
    cap = max(align, (min(tile_max, dim_r) // align) * align)
    if dim % align == 0:
        t = cap
        while t >= align:
            if dim % t == 0:
                return t, dim
            t -= align
    return cap, _round_up(dim, cap)


def _num_tensorcores_per_chip():
    # v7x has 2 TensorCores per chip; v5e/v6e have 1.  Heuristic, safe default.
    try:
        kind = jax.devices()[0].device_kind.lower()
    except Exception:
        return 1
    return 2 if ("v7" in kind or "7x" in kind) else 1


def _flash_attention_kernel(q_ref, k_ref, v_ref, o_ref,
                            m_ref, l_ref, acc_ref, qs_ref,
                            *, scale, tk, sk_valid, mask_tail, approx_recip):
    # q_ref: (1, tq, D), k_ref: (1, tk, D), v_ref: (1, tk, Dv_p)
    # o_ref: (1, tq, Dv_p)
    # scratch: m/l (tq, 1) f32, acc (tq, Dv_p) f32, qs (tq, D) compute dtype
    kv = pl.program_id(2)

    @pl.when(kv == 0)
    def _():
        m_ref[...] = jnp.full_like(m_ref, -jnp.inf)
        l_ref[...] = jnp.zeros_like(l_ref)
        acc_ref[...] = jnp.zeros_like(acc_ref)
        # Hoist the 1/sqrt(d_k) scaling out of the kv loop: the q block is the
        # same for every kv step of this (b, qi) tile, so scale it once.
        qs_ref[...] = q_ref[0] * jnp.asarray(scale, dtype=qs_ref.dtype)

    qs = qs_ref[...]       # (tq, D)   pre-scaled q, native/compute dtype
    k = k_ref[0]           # (tk, D)
    v = v_ref[0]           # (tk, Dv_p)

    # scores = q @ k^T without transposing k: contract the D axis of both.
    s = jax.lax.dot_general(
        qs, k,
        dimension_numbers=(((1,), (1,)), ((), ())),
        preferred_element_type=jnp.float32,
    )  # (tq, tk) float32

    if mask_tail:
        # Padding only exists in the final kv tile; interior tiles the compare
        # is all-true (cheap VPU filler under the MXU-bound matmuls).
        col = jax.lax.broadcasted_iota(jnp.int32, s.shape, 1) + kv * tk
        s = jnp.where(col < sk_valid, s, -jnp.inf)

    # Online (numerically stable) softmax update, all in f32.
    m_prev = m_ref[...]
    m_new = jnp.maximum(m_prev, jnp.max(s, axis=-1, keepdims=True))
    alpha = jnp.exp(m_prev - m_new)
    p = jnp.exp(s - m_new)

    l_ref[...] = alpha * l_ref[...] + jnp.sum(p, axis=-1, keepdims=True)
    acc_ref[...] = alpha * acc_ref[...] + jnp.dot(
        p.astype(v.dtype), v, preferred_element_type=jnp.float32)
    m_ref[...] = m_new

    @pl.when(kv == pl.num_programs(2) - 1)
    def _():
        inv = pl.reciprocal(l_ref[...], approx=approx_recip)
        o_ref[0] = (acc_ref[...] * inv).astype(o_ref.dtype)


def attention_weights(q, k, v, *, tq_max=512, tk_max=1024, matmul_dtype=None):
    """Pallas equivalent of AttentionWeigths.forward (dropout disabled).

    matmul_dtype: optionally cast q/k/v (e.g. to jnp.bfloat16) so the MXU runs
    at full rate; accumulation and softmax stay f32. Default None = native.
    """
    assert q.ndim >= 2 and q.ndim == k.ndim == v.ndim
    *lead, Sq, D = q.shape
    *lead_k, Sk, Dk = k.shape
    *lead_v, Skv, Dv = v.shape
    assert tuple(lead) == tuple(lead_k) == tuple(lead_v)
    assert D == Dk and Sk == Skv

    B = 1
    for d in lead:
        B *= d
    q3 = q.reshape(B, Sq, D)
    k3 = k.reshape(B, Sk, D)
    v3 = v.reshape(B, Sk, Dv)

    out_dtype = jnp.result_type(q.dtype, k.dtype, v.dtype)

    if matmul_dtype is not None:
        # Accuracy/speed tradeoff: bf16 operands, f32 accumulate (MXU-native).
        q3 = q3.astype(matmul_dtype)
        k3 = k3.astype(matmul_dtype)
        v3 = v3.astype(matmul_dtype)
    cdtype = q3.dtype
    c_item = jnp.dtype(cdtype).itemsize

    # Sublane multiple for the q/output row tile: 8 (f32) / 16 (bf16) / 32 (i8).
    q_align = max(8, 32 // max(1, c_item))

    # Tile sizes: prefer exact divisors of Sq/Sk (no padding copy); fall back
    # to padding otherwise. tk stays a multiple of 128 (lane dim of scores).
    tq, Sq_p = _choose_tile(Sq, tq_max, q_align)
    tk, Sk_p = _choose_tile(Sk, tk_max, 128)
    Dv_p = _round_up(Dv, 128)          # lane-dense output stores

    # v7x megacore: make sure there are >= 2 parallel (b, qi) tiles.
    if (_num_tensorcores_per_chip() >= 2
            and B * (Sq_p // tq) < 2 and Sq >= 2 * q_align):
        tq, Sq_p = _choose_tile(Sq, _round_up(-(-Sq // 2), q_align), q_align)

    if Sq_p != Sq:
        q3 = jnp.pad(q3, ((0, 0), (0, Sq_p - Sq), (0, 0)))
    if Sk_p != Sk:
        k3 = jnp.pad(k3, ((0, 0), (0, Sk_p - Sk), (0, 0)))
        v3 = jnp.pad(v3, ((0, 0), (0, Sk_p - Sk), (0, 0)))
    if Dv_p != Dv:
        v3 = jnp.pad(v3, ((0, 0), (0, 0), (0, Dv_p - Dv)))

    grid = (B, Sq_p // tq, Sk_p // tk)
    scale = 1.0 / math.sqrt(D)
    approx_recip = jnp.dtype(out_dtype).itemsize < 4   # exact recip for f32 out

    kernel = functools.partial(
        _flash_attention_kernel,
        scale=scale, tk=tk, sk_valid=Sk, mask_tail=(Sk_p != Sk),
        approx_recip=approx_recip)

    # VMEM budget derived from the actual working set: double-buffered q/k/v/o
    # blocks + scratch + (tq, tk) f32 score/prob intermediates, with headroom.
    out_item = jnp.dtype(out_dtype).itemsize
    blk_bytes = 2 * (tq * D + tk * D + tk * Dv_p) * c_item
    blk_bytes += 2 * tq * Dv_p * out_item
    scratch_bytes = 2 * tq * 4 + tq * Dv_p * 4 + tq * D * c_item
    interm_bytes = 2 * tq * tk * 4
    vmem_limit = int(1.5 * (blk_bytes + scratch_bytes + interm_bytes)) + (16 << 20)
    vmem_limit = max(32 << 20, min(vmem_limit, 64 << 20))

    out = pl.pallas_call(
        kernel,
        out_shape=jax.ShapeDtypeStruct((B, Sq_p, Dv_p), out_dtype),
        grid_spec=pltpu.PrefetchScalarGridSpec(
            num_scalar_prefetch=0,
            grid=grid,
            in_specs=[
                pl.BlockSpec((1, tq, D), lambda b, qi, ki: (b, qi, 0)),
                pl.BlockSpec((1, tk, D), lambda b, qi, ki: (b, ki, 0)),
                pl.BlockSpec((1, tk, Dv_p), lambda b, qi, ki: (b, ki, 0)),
            ],
            out_specs=pl.BlockSpec((1, tq, Dv_p), lambda b, qi, ki: (b, qi, 0)),
            scratch_shapes=[
                pltpu.VMEM((tq, 1), jnp.float32),      # running max m
                pltpu.VMEM((tq, 1), jnp.float32),      # running denom l
                pltpu.VMEM((tq, Dv_p), jnp.float32),   # output accumulator
                pltpu.VMEM((tq, D), cdtype),           # pre-scaled q (hoisted)
            ],
        ),
        compiler_params=pltpu.CompilerParams(
            dimension_semantics=("parallel", "parallel", "arbitrary"),
            vmem_limit_bytes=vmem_limit,
        ),
    )(q3, k3, v3)

    out = out[:, :Sq, :Dv]
    return out.reshape(*lead, Sq, Dv)


def _reference(q, k, v):
    qf = q.astype(jnp.float32)
    kf = k.astype(jnp.float32)
    vf = v.astype(jnp.float32)
    scores = jnp.einsum("...qd,...kd->...qk", qf, kf) / math.sqrt(q.shape[-1])
    attn = jax.nn.softmax(scores, axis=-1)
    return jnp.einsum("...qk,...kd->...qd", attn, vf).astype(q.dtype)


if __name__ == "__main__":
    key = jax.random.PRNGKey(0)
    k1, k2, k3, k4, k5, k6 = jax.random.split(key, 6)

    # Case 1: shapes consistent with the module (batch=2, seq=8, hidden=32).
    q = jax.random.normal(k1, (2, 8, 32), dtype=jnp.float32)
    k = jax.random.normal(k2, (2, 8, 32), dtype=jnp.float32)
    v = jax.random.normal(k3, (2, 8, 32), dtype=jnp.float32)
    out = attention_weights(q, k, v)
    jax.block_until_ready(out)
    ref = _reference(q, k, v)
    assert out.shape == ref.shape
    assert jnp.allclose(out, ref, atol=2e-3, rtol=2e-3), "case1 mismatch"

    # Case 2: multiple kv tiles + ragged Sk tail + Dv lane pad (+ q-tile split
    # on 2-core chips) to exercise the online-softmax / hoisted-scale paths.
    q2 = jax.random.normal(k4, (1, 64, 32), dtype=jnp.float32)
    k2 = jax.random.normal(k5, (1, 200, 32), dtype=jnp.float32)
    v2 = jax.random.normal(k6, (1, 200, 48), dtype=jnp.float32)
    out2 = attention_weights(q2, k2, v2)
    jax.block_until_ready(out2)
    ref2 = _reference(q2, k2, v2)
    assert out2.shape == ref2.shape
    assert jnp.allclose(out2, ref2, atol=2e-3, rtol=2e-3), "case2 mismatch"

    print("KERNEL_OK")
</pallas_src>

<mosaic_0001>
module attributes {stable_mosaic.version = 11 : i64} {
  func.func @_flash_attention_kernel(%arg0: i32, %arg1: i32, %arg2: i32, %arg3: memref<1x8x32xf32, #tpu.memory_space<vmem>>, %arg4: memref<1x128x32xf32, #tpu.memory_space<vmem>>, %arg5: memref<1x128x128xf32, #tpu.memory_space<vmem>>, %arg6: memref<1x8x128xf32, #tpu.memory_space<vmem>>, %arg7: memref<8x1xf32, #tpu.memory_space<vmem>>, %arg8: memref<8x1xf32, #tpu.memory_space<vmem>>, %arg9: memref<8x128xf32, #tpu.memory_space<vmem>>, %arg10: memref<8x32xf32, #tpu.memory_space<vmem>>) attributes {dimension_semantics = [#tpu.dimension_semantics<parallel>, #tpu.dimension_semantics<parallel>, #tpu.dimension_semantics<arbitrary>], iteration_bounds = array<i64: 2, 1, 1>, scalar_prefetch = 0 : i64, scratch_operands = 4 : i64, tpu.core_type = #tpu.core_type<tc>, window_params = [{transform_indices = @transform_0, window_bounds = array<i64: 1, 8, 32>}, {transform_indices = @transform_1, window_bounds = array<i64: 1, 128, 32>}, {transform_indices = @transform_2, window_bounds = array<i64: 1, 128, 128>}, {transform_indices = @transform_3, window_bounds = array<i64: 1, 8, 128>}]} {
    %c0_i32 = arith.constant 0 : i32
    %0 = arith.cmpi eq, %arg2, %c0_i32 : i32
    %1 = arith.extui %0 : i1 to i32
    %c0_i32_0 = arith.constant 0 : i32
    %2 = arith.cmpi ne, %1, %c0_i32_0 : i32
    scf.if %2 {
      %cst_26 = arith.constant 0xFF800000 : f32
      %42 = vector.broadcast %cst_26 : f32 to vector<8x1xf32>
      %c0_27 = arith.constant 0 : index
      %c0_28 = arith.constant 0 : index
      %43 = vector.load %arg7[%c0_27, %c0_28] : memref<8x1xf32, #tpu.memory_space<vmem>>, vector<8x1xf32>
      tpu.vector_store %arg7[%c0_27, %c0_28], %42 {strides = array<i32>} : memref<8x1xf32, #tpu.memory_space<vmem>>, vector<8x1xf32>,
      %cst_29 = arith.constant 0.000000e+00 : f32
      %44 = vector.broadcast %cst_29 : f32 to vector<8x1xf32>
      %c0_30 = arith.constant 0 : index
      %c0_31 = arith.constant 0 : index
      %45 = vector.load %arg8[%c0_30, %c0_31] : memref<8x1xf32, #tpu.memory_space<vmem>>, vector<8x1xf32>
      tpu.vector_store %arg8[%c0_30, %c0_31], %44 {strides = array<i32>} : memref<8x1xf32, #tpu.memory_space<vmem>>, vector<8x1xf32>,
      %cst_32 = arith.constant 0.000000e+00 : f32
      %46 = vector.broadcast %cst_32 : f32 to vector<8x128xf32>
      %c0_33 = arith.constant 0 : index
      %c0_34 = arith.constant 0 : index
      %47 = vector.load %arg9[%c0_33, %c0_34] : memref<8x128xf32, #tpu.memory_space<vmem>>, vector<8x128xf32>
      tpu.vector_store %arg9[%c0_33, %c0_34], %46 {strides = array<i32>} : memref<8x128xf32, #tpu.memory_space<vmem>>, vector<8x128xf32>,
      %c0_35 = arith.constant 0 : index
      %c0_36 = arith.constant 0 : index
      %c0_37 = arith.constant 0 : index
      %48 = vector.load %arg3[%c0_35, %c0_36, %c0_37] : memref<1x8x32xf32, #tpu.memory_space<vmem>>, vector<1x8x32xf32>
      %49 = vector.shape_cast %48 : vector<1x8x32xf32> to vector<8x32xf32>
      %cst_38 = arith.constant 0.176776692 : f32
      %50 = vector.broadcast %cst_38 : f32 to vector<8x32xf32>
      %51 = arith.mulf %49, %50 : vector<8x32xf32>
      %c0_39 = arith.constant 0 : index
      %c0_40 = arith.constant 0 : index
      %52 = vector.load %arg10[%c0_39, %c0_40] : memref<8x32xf32, #tpu.memory_space<vmem>>, vector<8x32xf32>
      tpu.vector_store %arg10[%c0_39, %c0_40], %51 {strides = array<i32>} : memref<8x32xf32, #tpu.memory_space<vmem>>, vector<8x32xf32>,
    } else {
    }
    %c0 = arith.constant 0 : index
    %c0_1 = arith.constant 0 : index
    %3 = vector.load %arg10[%c0, %c0_1] : memref<8x32xf32, #tpu.memory_space<vmem>>, vector<8x32xf32>
    %c0_2 = arith.constant 0 : index
    %c0_3 = arith.constant 0 : index
    %c0_4 = arith.constant 0 : index
    %4 = vector.load %arg4[%c0_2, %c0_3, %c0_4] : memref<1x128x32xf32, #tpu.memory_space<vmem>>, vector<1x128x32xf32>
    %5 = vector.shape_cast %4 : vector<1x128x32xf32> to vector<128x32xf32>
    %c0_5 = arith.constant 0 : index
    %c0_6 = arith.constant 0 : index
    %c0_7 = arith.constant 0 : index
    %6 = vector.load %arg5[%c0_5, %c0_6, %c0_7] : memref<1x128x128xf32, #tpu.memory_space<vmem>>, vector<1x128x128xf32>
    %7 = vector.shape_cast %6 : vector<1x128x128xf32> to vector<128x128xf32>
    %cst = arith.constant dense<0.000000e+00> : vector<8x128xf32>
    %8 = tpu.matmul %3, %5, %cst {dimension_numbers = #tpu.dot_dimension_numbers<[1], [1], [0], [0], [0, 0, 1, 0], [], []>} : vector<8x32xf32>, vector<128x32xf32>, vector<8x128xf32> -> vector<8x128xf32>
    %9 = tpu.iota {dimensions = array<i32: 1>} : vector<8x128xi32>
    %c128_i32 = arith.constant 128 : i32
    %10 = arith.muli %arg2, %c128_i32 : i32
    %11 = vector.broadcast %10 : i32 to vector<8x128xi32>
    %12 = arith.addi %9, %11 : vector<8x128xi32>
    %c8_i32 = arith.constant 8 : i32
    %13 = vector.broadcast %c8_i32 : i32 to vector<8x128xi32>
    %14 = arith.cmpi slt, %12, %13 : vector<8x128xi32>
    %cst_8 = arith.constant 0xFF800000 : f32
    %15 = vector.broadcast %cst_8 : f32 to vector<8x128xf32>
    %16 = arith.select %14, %8, %15 : vector<8x128xi1>, vector<8x128xf32>
    %c0_9 = arith.constant 0 : index
    %c0_10 = arith.constant 0 : index
    %17 = vector.load %arg7[%c0_9, %c0_10] : memref<8x1xf32, #tpu.memory_space<vmem>>, vector<8x1xf32>
    %cst_11 = arith.constant dense<0xFF800000> : vector<8xf32>
    %18 = vector.multi_reduction <maximumf>, %16, %cst_11 [1] : vector<8x128xf32> to vector<8xf32>
    %19 = vector.shape_cast %18 : vector<8xf32> to vector<8x1xf32>
    %20 = arith.maximumf %17, %19 : vector<8x1xf32>
    %21 = arith.subf %17, %20 : vector<8x1xf32>
    %22 = math.exp %21 : vector<8x1xf32>
    %23 = vector.broadcast %20 : vector<8x1xf32> to vector<8x128xf32>
    %24 = arith.subf %16, %23 : vector<8x128xf32>
    %25 = math.exp %24 : vector<8x128xf32>
    %c0_12 = arith.constant 0 : index
    %c0_13 = arith.constant 0 : index
    %26 = vector.load %arg8[%c0_12, %c0_13] : memref<8x1xf32, #tpu.memory_space<vmem>>, vector<8x1xf32>
    %27 = arith.mulf %22, %26 : vector<8x1xf32>
    %cst_14 = arith.constant dense<0.000000e+00> : vector<8xf32>
    %28 = vector.multi_reduction <add>, %25, %cst_14 [1] : vector<8x128xf32> to vector<8xf32>
    %29 = vector.shape_cast %28 : vector<8xf32> to vector<8x1xf32>
    %30 = arith.addf %27, %29 : vector<8x1xf32>
    %c0_15 = arith.constant 0 : index
    %c0_16 = arith.constant 0 : index
    %31 = vector.load %arg8[%c0_15, %c0_16] : memref<8x1xf32, #tpu.memory_space<vmem>>, vector<8x1xf32>
    tpu.vector_store %arg8[%c0_15, %c0_16], %30 {strides = array<i32>} : memref<8x1xf32, #tpu.memory_space<vmem>>, vector<8x1xf32>,
    %c0_17 = arith.constant 0 : index
    %c0_18 = arith.constant 0 : index
    %32 = vector.load %arg9[%c0_17, %c0_18] : memref<8x128xf32, #tpu.memory_space<vmem>>, vector<8x128xf32>
    %33 = vector.broadcast %22 : vector<8x1xf32> to vector<8x128xf32>
    %34 = arith.mulf %33, %32 : vector<8x128xf32>
    %cst_19 = arith.constant dense<0.000000e+00> : vector<8x128xf32>
    %35 = tpu.matmul %25, %7, %cst_19 {dimension_numbers = #tpu.dot_dimension_numbers<[1], [0], [0], [1], [0, 0, 1, 1], [], []>} : vector<8x128xf32>, vector<128x128xf32>, vector<8x128xf32> -> vector<8x128xf32>
    %36 = arith.addf %34, %35 : vector<8x128xf32>
    %c0_20 = arith.constant 0 : index
    %c0_21 = arith.constant 0 : index
    %37 = vector.load %arg9[%c0_20, %c0_21] : memref<8x128xf32, #tpu.memory_space<vmem>>, vector<8x128xf32>
    tpu.vector_store %arg9[%c0_20, %c0_21], %36 {strides = array<i32>} : memref<8x128xf32, #tpu.memory_space<vmem>>, vector<8x128xf32>,
    %c0_22 = arith.constant 0 : index
    %c0_23 = arith.constant 0 : index
    %38 = vector.load %arg7[%c0_22, %c0_23] : memref<8x1xf32, #tpu.memory_space<vmem>>, vector<8x1xf32>
    tpu.vector_store %arg7[%c0_22, %c0_23], %20 {strides = array<i32>} : memref<8x1xf32, #tpu.memory_space<vmem>>, vector<8x1xf32>,
    %c0_i32_24 = arith.constant 0 : i32
    %39 = arith.cmpi eq, %arg2, %c0_i32_24 : i32
    %40 = arith.extui %39 : i1 to i32
    %c0_i32_25 = arith.constant 0 : i32
    %41 = arith.cmpi ne, %40, %c0_i32_25 : i32
    scf.if %41 {
      %c0_26 = arith.constant 0 : index
      %c0_27 = arith.constant 0 : index
      %42 = vector.load %arg8[%c0_26, %c0_27] : memref<8x1xf32, #tpu.memory_space<vmem>>, vector<8x1xf32>
      %43 = tpu.reciprocal %42 : vector<8x1xf32> -> vector<8x1xf32>
      %c0_28 = arith.constant 0 : index
      %c0_29 = arith.constant 0 : index
      %44 = vector.load %arg9[%c0_28, %c0_29] : memref<8x128xf32, #tpu.memory_space<vmem>>, vector<8x128xf32>
      %45 = vector.broadcast %43 : vector<8x1xf32> to vector<8x128xf32>
      %46 = arith.mulf %44, %45 : vector<8x128xf32>
      %c0_30 = arith.constant 0 : index
      %c0_31 = arith.constant 0 : index
      %c0_32 = arith.constant 0 : index
      %47 = vector.load %arg6[%c0_30, %c0_31, %c0_32] : memref<1x8x128xf32, #tpu.memory_space<vmem>>, vector<1x8x128xf32>
      %48 = vector.shape_cast %47 : vector<1x8x128xf32> to vector<8x128xf32>
      %49 = vector.shape_cast %46 : vector<8x128xf32> to vector<1x8x128xf32>
      tpu.vector_store %arg6[%c0_30, %c0_31, %c0_32], %49 {strides = array<i32>} : memref<1x8x128xf32, #tpu.memory_space<vmem>>, vector<1x8x128xf32>,
    } else {
    }
    return
  }
  func.func @transform_0(%arg0: i32, %arg1: i32, %arg2: i32) -> (i32, i32, i32) {
    %c0_i32 = arith.constant 0 : i32
    %c0_i32_0 = arith.constant 0 : i32
    return %arg0, %arg1, %c0_i32 : i32, i32, i32
  }
  func.func @transform_1(%arg0: i32, %arg1: i32, %arg2: i32) -> (i32, i32, i32) {
    %c0_i32 = arith.constant 0 : i32
    %c0_i32_0 = arith.constant 0 : i32
    return %arg0, %arg2, %c0_i32 : i32, i32, i32
  }
  func.func @transform_2(%arg0: i32, %arg1: i32, %arg2: i32) -> (i32, i32, i32) {
    %c0_i32 = arith.constant 0 : i32
    %c0_i32_0 = arith.constant 0 : i32
    return %arg0, %arg2, %c0_i32 : i32, i32, i32
  }
  func.func @transform_3(%arg0: i32, %arg1: i32, %arg2: i32) -> (i32, i32, i32) {
    %c0_i32 = arith.constant 0 : i32
    %c0_i32_0 = arith.constant 0 : i32
    return %arg0, %arg1, %c0_i32 : i32, i32, i32
  }
}

</mosaic_0001>

<bundles_post_ra>
// kernel: tpu_custom_call.1
= control target key start
LH: loop header
LB: loop body
LE: loop exit
PB: predicated region body
PF: predicated region fallthrough
CT: control target
= control target key end

     0   :  { %8 = vsyncpa [#allocation7], 0  ;;  %s1258_s0 = inlined_call_operand.vmem [shape: f32[2,8,32], index: 0, kind: input, shape index: {}]   ;;  %s1259_s1 = inlined_call_operand.vmem [shape: f32[2,128,32], index: 1, kind: input, shape index: {}]   ;;  %s1260_s2 = inlined_call_operand.vmem [shape: f32[2,128,128], index: 2, kind: input, shape index: {}]   ;;  %s1261_s3 = inlined_call_operand.hbm [shape: f32[2,8,128], index: 3, kind: output, shape index: {}]  }
   0x1   :  { %10 = vsyncpa [#allocation7 + $0x1], 0  ;;  %s1052_s12 = smov 0   ;;  %s1054_s13 = smov 0  }
   0x2   :  { %s1056_s14 = smov 0   ;;  %s1058_s15 = smov 0  }
   0x3   :  { %s1060_s16 = smov 0   ;;  %s1062_s17 = smov 0  }
   0x4 LB: > { %s684_s18 = sadd.s32 4294967295, %s1024_s17   ;;  %s685_s19 = sadd.s32 4294967294, %s1024_s17   ;;  %s1024_s17 = sphi %s1062_s17, %s16_s17   ;;  %s1020_s16 = sphi %s1060_s16, %s1270_s16   ;;  %s1016_s15 = sphi %s1058_s15, %s1269_s15   ;;  %s1012_s14 = sphi %s1056_s14, %s1268_s14   ;;  %s1008_s13 = sphi %s1054_s13, %s1267_s13   ;;  %s1004_s12 = sphi %s1052_s12, %s1266_s12  }
   0x5   : > { %s35_s20 = sadd.s32 1, %s1020_s16  ;;  %s128_s21 = sadd.s32 1, %s1012_s14 }
   0x6   : > { %p37_p0 = scmp.ge.s32.totalorder %s35_s20, 2  ;;  %p138_p1 = scmp.ne.s32.totalorder %s1012_s14, %s1008_s13 }
   0x7   : > { %p139_p2 = scmp.eq.s32.totalorder %s684_s18, 1  ;;  %p144_p3 = scmp.ne.s32.totalorder %s1008_s13, %s1004_s12 }
   0x8   : > { %s1272_s20 = smov (%p37_p0, %s35_s20), 0  ;;  %p145_p5 = scmp.eq.s32.totalorder %s685_s19, 1 }
   0x9   : > { %p1092_p4 = por %p139_p2, %p138_p1  ;;  %s123_s23 = ssub.s32 %s1020_s16, %s1272_s20 }
   0xa   : > { %p688_p6 = scmp.ge.s32.totalorder %s1024_s17, 1  ;;  %p126_p7 = scmp.eq.s32.totalorder %s123_s23, 0 }
   0xb   : > { %p1099_p8 = por %p145_p5, %p144_p3  ;;  %p199_p9 = scmp.lt.s32.totalorder %s1024_s17, 3 }
   0xc   : > { %s1105_s25 = scalar_select %p126_p7, %s1012_s14, %s128_s21  }
   0xd   : > { %p200_p10 = pnand %p688_p6, %p199_p9 }
   0xe   : > { %p243_p11 = scmp.lt.s32.totalorder (!%p200_p10), %s1016_s15, 1  ;;  %vm274_vm0 = vcmask (!%p200_p10), 7168   ;;  %v1026_v0 = vmov (!%p200_p10), 0.0|0.0   ;;  %v1027_v1 = vmov (!%p200_p10), 0.0   ;;  %vm280_vm1 = vcmask (!%p200_p10), 261120   ;;  %s240_s11 = sand.u32 (!%p200_p10), 1, %s1008_s13  }
   0xf   : > { %203 = sbr.rel (%p200_p10) target bundleno = 900 (0x384), region = 32  ;;  %822 = vmatprep.subr.bf16.mxu0 (!%p200_p10), %v1026_v0  ;;  %276 = vst.msk [vmem:[#allocation3] sm:$0xff] (!%p200_p10), %vm274_vm0, %v1027_v1  ;;  %854 = vmatprep.subr.bf16.mxu1 (!%p200_p10), %v1026_v0  ;;  %vm1028_vm2 = vmmov (!%p200_p10), 0   ;;  %vm1128_vm3 = vmpackc.low (!%p200_p10), %vm280_vm1, %vm280_vm1  ;;  %v1029_v30 = vmov (!%p200_p10), -inf   ;;  %v437_v31 = vlaneseq (!%p200_p10)  ;;  %v1030_v36 = vmov (!%p200_p10), 0   ;;  %s689_s18 = sshll.u32 (!%p200_p10), %s240_s11, 3 }
  0x10   : > { %784 = vmatprep.mubr.msk.f32.mxu0 (!%p200_p10), %vm1028_vm2, %v1027_v1  ;;  %819 = vmatprep.mubr.msk.f32.mxu1 (!%p200_p10), %vm1028_vm2, %v1027_v1  ;;  %275 = vst.msk [vmem:[#allocation2] sm:$0xff] (!%p200_p10), %vm274_vm0, %v1029_v30  ;;  %s713_s19 = sshll.u32 (!%p200_p10), %s1016_s15, 7  ;;  %s242_s21 = scalar_lea.vmem (!%p200_p10), [#allocation6], %s689_s18 }
  0x11   : > { %v438_v32 = vand.u32 (!%p200_p10), 127, %v437_v31  ;;  %938 = vset.pattern.permute.xlu0 (!%p200_p10), %v1030_v36  ;;  %939 = vset.pattern.permute.xlu1 (!%p200_p10), %v1030_v36  ;;  %s574_s23 = sshll.u32 (!%p200_p10), %s242_s21, 4  ;;  %s560_s29 = scalar_lea.sflag (!%p200_p10), [#allocation7], %s240_s11  ;;  %s1213_s23 = int_to_ptr.vmem [resolvable:$true] %s574_s23 }
  0x12   : > { %s946_s30 = scalar_lea.vmem (!%p200_p10), %s1213_s23, 128 }
  0x13   : > { %vm442_vm4 = vcmp.lt.s32.totalorder (!%p200_p10), %v438_v32, 8  ;;  %p947_p12 = scmp.ne.s32.totalorder (!%p200_p10), %s1213_s23, %s946_s30 }
  0x15   : > { %p948_p13 = pnand (!%p200_p10), %p947_p12, %p1092_p4 }
  0x16   : > { %s1112_s26 = scalar_select %p243_p11, %s1016_s15, 1 }
  0x17   : > { %v444_v49 = vld [vmem:[#allocation2] sm:$0xff]  ;;  %p949_p0 = pneg %p948_p13  ;;  %s1031_s15 = smov [#allocation6]  }
  0x18   : > { %s690_s27 = sshll.u32 %s1112_s26, 3  ;;  %s716_s28 = sshll.u32 %s1112_s26, 7 }
  0x19   : > { %s249_s4 = scalar_lea.vmem %s1258_s0, %s690_s27  ;;  %s1124_s7 = scalar_lea.vmem %s1259_s1, %s716_s28 }
  0x1a   : > { %v278_v3 = vld [vmem:[%s249_s4] sm:$0xff]  ;;  %v284_v5 = vld [vmem:[%s1124_s7 + $0x8] sm:$0xff]  ;;  %v285_v8 = vld [vmem:[%s1124_s7 + $0x10] sm:$0xff]  ;;  %s1179_s10 = scalar_lea.vmem %s1260_s2, %s716_s28  ;;  %s1211_s28 = scalar_lea.hbm %s1261_s3, %s713_s19 }
  0x1b   : > { %v283_v4 = vld [vmem:[%s1124_s7] sm:$0xff]  ;;  %v279_v6 = vmul.f32 0.17677669, %v278_v3  ;;  %v286_v9 = vld [vmem:[%s1124_s7 + $0x18] sm:$0xff]  ;;  %v288_v12 = vld [vmem:[%s1124_s7 + $0x28] sm:$0xff]  ;;  %s950_s4 = sshll.u32 %s1031_s15, 4  ;;  %s951_s4 = int_to_ptr.vmem [resolvable:$false] %s950_s4 }
  0x1c   : > { %v823_v7 = vpack.c.bf16 %v284_v5, %v283_v4  ;;  %v827_v10 = vpack.c.bf16 %v286_v9, %v285_v8  ;;  %v287_v11 = vld [vmem:[%s1124_s7 + $0x20] sm:$0xff]  ;;  %v289_v14 = vld [vmem:[%s1124_s7 + $0x30] sm:$0xff]  ;;  %v290_v15 = vld [vmem:[%s1124_s7 + $0x38] sm:$0xff]  ;;  %s952_s5 = scalar_lea.vmem %s951_s4, 256  ;;  %p953_p1 = scmp.lt.s32.totalorder %s1213_s23, %s951_s4 }
  0x1d   : > { %281 = vst.msk [vmem:[#allocation5] sm:$0xff] %vm280_vm1, %v279_v6  ;;  %v831_v13 = vpack.c.bf16 %v288_v12, %v287_v11  ;;  %v835_v16 = vpack.c.bf16 %v290_v15, %v289_v14  ;;  %v291_v17 = vld [vmem:[%s1124_s7 + $0x40] sm:$0xff]  ;;  %v292_v18 = vld [vmem:[%s1124_s7 + $0x48] sm:$0xff]  ;;  %v293_v20 = vld [vmem:[%s1124_s7 + $0x50] sm:$0xff]  ;;  %p954_p2 = scmp.lt.s32.totalorder %s952_s5, %s946_s30 }
  0x1e   : > { %825 = vmatpush3.bf16.xpose.msk.msra.mxu0 %vm1128_vm3, %v823_v7  ;;  %v839_v19 = vpack.c.bf16 %v292_v18, %v291_v17  ;;  %v294_v21 = vld [vmem:[%s1124_s7 + $0x58] sm:$0xff]  ;;  %v295_v23 = vld [vmem:[%s1124_s7 + $0x60] sm:$0xff]  ;;  %v296_v24 = vld [vmem:[%s1124_s7 + $0x68] sm:$0xff] }
  0x1f   : > { %826 = vmatprep.subr.bf16.mxu0 %v1026_v0  ;;  %v843_v22 = vpack.c.bf16 %v294_v21, %v293_v20  ;;  %v847_v25 = vpack.c.bf16 %v296_v24, %v295_v23  ;;  %v297_v26 = vld [vmem:[%s1124_s7 + $0x70] sm:$0xff]  ;;  %v298_v27 = vld [vmem:[%s1124_s7 + $0x78] sm:$0xff]  ;;  %v299_v37 = vld [vmem:[%s1179_s10] sm:$0xff]  ;;  %p955_p3 = por %p954_p2, %p953_p1 }
  0x20   : > { %v851_v28 = vpack.c.bf16 %v298_v27, %v297_v26  ;;  %v300_v38 = vld [vmem:[%s1179_s10 + $0x8] sm:$0xff]  ;;  %v301_v39 = vld [vmem:[%s1179_s10 + $0x10] sm:$0xff]  ;;  %v302_v41 = vld [vmem:[%s1179_s10 + $0x18] sm:$0xff] }
  0x21   : > { %v855_v40 = vpack.c.bf16 %v300_v38, %v299_v37  ;;  %v858_v42 = vpack.c.bf16 %v302_v41, %v301_v39  ;;  %v303_v43 = vld [vmem:[%s1179_s10 + $0x20] sm:$0xff]  ;;  %v304_v44 = vld [vmem:[%s1179_s10 + $0x28] sm:$0xff]  ;;  %v305_v46 = vld [vmem:[%s1179_s10 + $0x30] sm:$0xff]  ;;  %p956_p5 = pnand %p955_p3, %p949_p0 }
  0x22   : > { %v861_v45 = vpack.c.bf16 %v304_v44, %v303_v43  ;;  %v306_v47 = vld [vmem:[%s1179_s10 + $0x38] sm:$0xff]  ;;  %v307_v51 = vld [vmem:[%s1179_s10 + $0x40] sm:$0xff]  ;;  %v308_v52 = vld [vmem:[%s1179_s10 + $0x48] sm:$0xff] }
  0x23   : > { %856 = vmatpush3.bf16.msra.mxu1 %v855_v40  ;;  %v864_v48 = vpack.c.bf16 %v306_v47, %v305_v46  ;;  %v867_v54 = vpack.c.bf16 %v308_v52, %v307_v51  ;;  %v309_v56 = vld [vmem:[%s1179_s10 + $0x50] sm:$0xff]  ;;  %v310_v57 = vld [vmem:[%s1179_s10 + $0x58] sm:$0xff]  ;;  %v311_v59 = vld [vmem:[%s1179_s10 + $0x60] sm:$0xff] }
  0x24   : > { %v282_v29 = vld [vmem:[#allocation5] sm:$0xff]  ;;  %857 = vmatprep.subr.bf16.mxu1 %v1026_v0  ;;  %v870_v58 = vpack.c.bf16 %v310_v57, %v309_v56  ;;  %v312_v60 = vld [vmem:[%s1179_s10 + $0x68] sm:$0xff]  ;;  %v314_v63 = vld [vmem:[%s1179_s10 + $0x78] sm:$0xff] }
  0x25   : > { %v873_v61 = vpack.c.bf16 %v312_v60, %v311_v59  ;;  %v313_v62 = vld [vmem:[%s1179_s10 + $0x70] sm:$0xff]  ;;  %v459_v8 = vld [vmem:[#allocation3] sm:$0xff] }
  0x26   : > { %829 = vmatpush3.bf16.xpose.msk.msra.mxu0 %vm1128_vm3, %v827_v10  ;;  %v876_v1 = vpack.c.bf16 %v314_v63, %v313_v62 }
  0x27   : > { %830 = vmatprep.subr.bf16.mxu0 %v1026_v0  ;;  %859 = vmatpush3.bf16.msra.mxu1 %v858_v42 }
  0x28   : > { %860 = vmatprep.subr.bf16.mxu1 %v1026_v0 }
  0x2b   : > { %862 = vmatpush3.bf16.msra.mxu1 %v861_v45 }
  0x2c   : > { %863 = vmatprep.subr.bf16.mxu1 %v1026_v0 }
  0x2e   : > { %833 = vmatpush3.bf16.xpose.msk.msra.mxu0 %vm1128_vm3, %v831_v13 }
  0x2f   : > { %834 = vmatprep.subr.bf16.mxu0 %v1026_v0  ;;  %865 = vmatpush3.bf16.msra.mxu1 %v864_v48 }
  0x30   : > { %866 = vmatprep.subr.bf16.mxu1 %v1026_v0 }
  0x33   : > { %868 = vmatpush3.bf16.msra.mxu1 %v867_v54 }
  0x34   : > { %869 = vmatprep.subr.bf16.mxu1 %v1026_v0 }
  0x36   : > { %837 = vmatpush3.bf16.xpose.msk.msra.mxu0 %vm1128_vm3, %v835_v16 }
  0x37   : > { %838 = vmatprep.subr.bf16.mxu0 %v1026_v0  ;;  %871 = vmatpush3.bf16.msra.mxu1 %v870_v58 }
  0x38   : > { %872 = vmatprep.subr.bf16.mxu1 %v1026_v0 }
  0x3b   : > { %874 = vmatpush3.bf16.msra.mxu1 %v873_v61 }
  0x3c   : > { %875 = vmatprep.subr.bf16.mxu1 %v1026_v0 }
  0x3e   : > { %841 = vmatpush3.bf16.xpose.msk.msra.mxu0 %vm1128_vm3, %v839_v19 }
  0x3f   : > { %842 = vmatprep.subr.bf16.mxu0 %v1026_v0  ;;  %877 = vmatpush3.bf16.msra.mxu1 %v876_v1 }
  0x46   : > { %845 = vmatpush3.bf16.xpose.msk.msra.mxu0 %vm1128_vm3, %v843_v22 }
  0x47   : > { %846 = vmatprep.subr.bf16.mxu0 %v1026_v0 }
  0x4e   : > { %849 = vmatpush3.bf16.xpose.msk.msra.mxu0 %vm1128_vm3, %v847_v25 }
  0x4f   : > { %850 = vmatprep.subr.bf16.mxu0 %v1026_v0 }
  0x56   : > { %853 = vmatpush3.bf16.xpose.msk.msra.mxu0 %vm1128_vm3, %v851_v28 }
  0x5d   : > { %785 = vmatmul.mubr.msk.f32.vlgmr.msra.gmra.mrb[0].mxu0 %vm280_vm1, %v282_v29 }
 0x130   : > { %v433_v33 = vpop.f32.mrb[0].mxu0 }
 0x131   : > { %v786_v34 = vpop.f32.mrb[1].mxu0  ;;  %v443_v35 = vsel %vm442_vm4, %v433_v33, -inf }
 0x132   : > { %445 = vmax.xlane.f32.xlu0 %v443_v35 }
 0x1bf   : > { %v446_v50 = vpop.xlane.xlu0 %445 }
 0x1c0   : > { %v447_v53 = vmax.f32 %v444_v49, %v446_v50 }
 0x1c2   : > { %v448_v55 = vsub.f32 %v444_v49, %v447_v53  ;;  %545 = vst.msk [vmem:[#allocation2] sm:$0xff] %vm274_vm0, %v447_v53  ;;  %453 = vperm.xlu0 %938, %v447_v53  }
 0x1c4   : > { %v449_v6 = vmul.f32 1.442695, %v448_v55 }
 0x241   : > { %v454_v2 = vpop.permute.xlu0 %453 }
 0x242   : > { %v456_v3 = vsub.f32 %v443_v35, %v454_v2 }
 0x244   : > { %v457_v4 = vmul.f32 1.442695, %v456_v3 }
 0x246   : > { %940 = vpow2.f32 %v457_v4 }
 0x247   : > { %942 = vpow2.f32 %v449_v6 }
 0x250   : > { %v941_v5 = vpop.eup %940 }
 0x251   : > { %461 = vadd.xlane.f32.xlu1 %v941_v5  ;;  %820 = vmatmul.mubr.f32.vlgmr.msra.gmra.mrb[0].mxu1 %v941_v5  ;;  %v943_v7 = vpop.eup %942 }
 0x252   : > { %v460_v9 = vmul.f32 %v943_v7, %v459_v8 }
 0x262   : > { %469 = vperm.xlu1 %939, %v943_v7  }
 0x2de   : > { %v462_v10 = vpop.xlane.xlu1 %461 }
 0x2df   : > { %v463_v11 = vadd.f32 %v462_v10, %v460_v9 }
 0x2e1   : > { %465 = vst.msk [vmem:[#allocation3] sm:$0xff] %vm274_vm0, %v463_v11 }
 0x2e2   : > { %v470_v15 = vpop.permute.xlu1 %469 }
 0x2e3   : > { %v472_v16 = vmul.f32 0.0, %v470_v15 }
 0x2e8   : > { %v549_v0 = vld [vmem:[#allocation3] sm:$0xff] }
 0x2e9   : > { %944 = vrcp.f32 %v549_v0 }
 0x2f3   : > { %v945_v12 = vpop.eup %944 }
 0x2f4   : > { %554 = vperm.xlu1 %939, %v945_v12  }
 0x324   : > { %v539_v13 = vpop.f32.mrb[0].mxu1 }
 0x325   : > { %v821_v14 = vpop.f32.mrb[1].mxu1  ;;  %v543_v17 = vadd.f32 %v539_v13, %v472_v16 }
 0x373   : > { %v555_v18 = vpop.permute.xlu1 %554 }
 0x374   : > { %v557_v19 = vmul.f32 %v555_v18, %v543_v17 }
 0x376   : > { %558 = vst [vmem:[%s242_s21] sm:$0xff] %v557_v19 }
 0x377   : > { %959 = shalt.err (!%p956_p5)
}
 0x378   : > { %s960_s6 = scalar_lea.hbm %s1211_s28, 128  ;;  %s964_s9 = scalar_lea.hbm %s1261_s3, 256 }
 0x379   : > { %p961_p6 = scmp.ne.s32.totalorder %s1211_s28, %s960_s6  ;;  %p965_p10 = scmp.lt.u32.totalorder %s1211_s28, %s1261_s3 }
 0x37a   : > { %p966_p11 = scmp.lt.u32.totalorder %s964_s9, %s960_s6  ;;  %p968_p13 = scmp.lt.u32.totalorder %s960_s6, %s1211_s28 }
 0x37b   : > { %p962_p7 = pnand %p961_p6, %p1092_p4 }
 0x37c   : > { %p967_p12 = por %p966_p11, %p965_p10 }
 0x37d   : > { %p963_p9 = pneg %p962_p7 }
 0x37e   : > { %p969_p0 = por %p968_p13, %p967_p12 }
 0x380   : > { %p970_p1 = pnand %p969_p0, %p963_p9 }
 0x382   : > { %973 = shalt.err (!%p970_p1)
}
 0x383   : > { %878 = dma.vmem_to_hbm [thread:$0]  (%p1092_p4), %s1213_s23, 128, %s1211_s28, %s560_s29  }
 0x384 PF: > { %p884_p2 = scmp.ge.s32.totalorder %s1024_s17, 2  ;;  %s586_s18 = sand.u32 1, %s1004_s12  }
 0x385   : > { %s587_s19 = scalar_lea.sflag [#allocation7], %s586_s18 }
 0x386   : > { %p881_p3 = pnand %p884_p2, %p1099_p8 }
 0x388   : > { %999 = dma.done.wait (!%p881_p3), %s587_s19, 128  }
 0x389   : > { %1001 = vsyncadd (!%p881_p3), %s587_s19, 4294967168  ;;  %s16_s17 = sadd.s32 1, %s1024_s17   ;;  %s1266_s12 = smov %s1008_s13 }
 0x38a   : > { %p13_p5 = scmp.ge.s32.totalorder %s16_s17, 4   ;;  %s1267_s13 = smov %s1012_s14 }
 0x38b   : > { %s1268_s14 = smov %s1105_s25  ;;  %s1269_s15 = smov %s1020_s16 }
 0x38c   : > { %s1270_s16 = smov %s1272_s20  ;;  %15 = sbr.rel (!%p13_p5) target bundleno = 4 (0x4), region = 81 }
 0x393   :  { %592 = vsyncpa [#allocation7], 1 }
 0x394   :  { %594 = vsyncpa [#allocation7 + $0x1], 1 }

</bundles_post_ra>
